<compile_context>
chip_gen: v7x
topology: tpu7x:2x2x1
jax: 0.10.0
libtpu: 0.0.40
codegen_flags: <defaults>
</compile_context>

<pallas_src>
import numpy as np
import jax
import jax.numpy as jnp
from jax.experimental import pallas as pl
from jax.experimental.pallas import tpu as pltpu


# ----------------------------------------------------------------------------
# Kernel
# ----------------------------------------------------------------------------
def drug_gnn_kernel(cs_ref, adj_ref, xw_ref, shift1_ref, pool_ref,
                    out_ref, t_acc_ref):
    """Grid = (core split c, row tile i, banded column tile k); k innermost.

    out_ref  : (G, H) f32 per-core partial pooled features (leading c squeezed)
    t_acc_ref: (tile_n, H) f32 accumulator of adj_tile @ xw over column tiles
    """
    del cs_ref  # only used by the index_maps (scalar prefetch)
    i = pl.program_id(1)
    k = pl.program_id(2)
    last_k = pl.num_programs(2) - 1

    @pl.when(jnp.logical_and(i == 0, k == 0))
    def _init_out():
        out_ref[...] = jnp.zeros_like(out_ref)

    @pl.when(k == 0)
    def _init_t():
        t_acc_ref[...] = jnp.zeros_like(t_acc_ref)

    # GCN propagation, banded column block: partial adj_tile @ xw, f32 accum.
    t_acc_ref[...] += jnp.dot(adj_ref[...], xw_ref[...],
                              preferred_element_type=jnp.float32)

    @pl.when(k == last_k)
    def _pool():
        # Folded GCN bias + BN1 shift, ReLU.  Dropout(p=0.5, eval) = identity.
        h = jnp.maximum(t_acc_ref[...] + shift1_ref[...], 0.0)
        # Partial global_mean_pool for this row block (pool & accum kept f32).
        out_ref[...] += jnp.dot(pool_ref[...], h,
                                preferred_element_type=jnp.float32)


# ----------------------------------------------------------------------------
# Host-side helpers
# ----------------------------------------------------------------------------
def _fold_params(params, eps=1e-5):
    """Fold BatchNorm1d (eval) + biases into the weight matrices (exact)."""
    bn1_scale = params["bn1_w"] / jnp.sqrt(params["bn1_rv"] + eps)
    bn1_shift = params["bn1_b"] - params["bn1_rm"] * bn1_scale
    bn2_scale = params["bn2_w"] / jnp.sqrt(params["bn2_rv"] + eps)
    bn2_shift = params["bn2_b"] - params["bn2_rm"] * bn2_scale
    w1p = params["w1"].T * bn1_scale[None, :]                   # [F, H]
    shift1 = (params["b1"] * bn1_scale + bn1_shift)[None, :]    # [1, H]
    w2p = params["w2"].T * bn2_scale[None, :]                   # [H, C]
    shift2 = (params["b2"] * bn2_scale + bn2_shift)[None, :]    # [1, C]
    return (w1p.astype(jnp.float32), shift1.astype(jnp.float32),
            w2p.astype(jnp.float32), shift2.astype(jnp.float32))


def _vmem_limit_bytes():
    """Per-generation VMEM budget (v7x has half the VMEM of v5e/v6e)."""
    try:
        cap = int(pltpu.get_tpu_info().vmem_capacity_bytes)
        return min(cap * 3 // 4, 100 * 1024 * 1024)
    except Exception:
        return 32 * 1024 * 1024   # safe default on all generations


def _pick_tile(num_nodes, itemsize, vmem_limit_bytes):
    """Largest square adj tile (multiple of 128) whose double buffer fits."""
    n128 = -(-num_nodes // 128) * 128
    budget = vmem_limit_bytes // 2        # adj double-buffer share
    for t in (2048, 1024, 512, 256, 128):
        if t <= n128 and 2 * t * t * itemsize <= budget:
            return t
    return 128                            # always VMEM-safe: K is tiled too


def _column_band(adj_hat, num_nodes, tile_n, tile_k, n_row_tiles, n_col_tiles):
    """Per-row-tile banded column-tile window (start array + uniform width).

    Derived from the concrete adjacency's non-zero structure: for PyG-style
    batches adj_hat is block-diagonal, so each row tile only needs the column
    blocks of its own graph(s).  Falls back to the full width if adj_hat is
    not concrete (e.g. traced under jit).
    """
    try:
        adj_np = np.asarray(jax.device_get(adj_hat))
    except Exception:
        return np.zeros(n_row_tiles, np.int32), n_col_tiles

    nz = adj_np != 0.0
    k_lo = np.zeros(n_row_tiles, np.int64)
    k_hi = np.zeros(n_row_tiles, np.int64)
    for t in range(n_row_tiles):
        r0 = t * tile_n
        r1 = min(r0 + tile_n, num_nodes)
        if r0 >= num_nodes:
            continue                       # pure padding rows: any band works
        cols = nz[r0:r1].any(axis=0)
        if not cols.any():
            continue
        lo = int(cols.argmax())
        hi = int(num_nodes - 1 - cols[::-1].argmax())
        k_lo[t] = lo // tile_k
        k_hi[t] = hi // tile_k
    n_band = int((k_hi - k_lo + 1).max())
    col_start = np.minimum(k_lo, n_col_tiles - n_band).astype(np.int32)
    return col_start, n_band


def drug_gnn_forward(x, adj_hat, pool, params, *, tile_n=None, tile_k=None,
                     matmul_dtype=jnp.bfloat16, core_splits=2):
    """DrugGNN eval forward.  adj_hat: [N,N] dense sym-norm adjacency,
    pool: [G,N] mean-pool matrix.  Returns [G, num_classes]."""
    N, F = x.shape
    G = pool.shape[0]
    H = params["w1"].shape[0]

    w1p, shift1, w2p, shift2 = _fold_params(params)
    hp = jax.lax.Precision.HIGHEST

    # GCNConv applies its Linear before propagation: xw = x @ W1' (BN1 folded).
    xw = jnp.dot(x.astype(jnp.float32), w1p, precision=hp)          # [N, H]

    itemsize = jnp.dtype(matmul_dtype).itemsize
    vmem_limit = _vmem_limit_bytes()
    if tile_n is None:
        tile_n = _pick_tile(N, itemsize, vmem_limit)
    if tile_k is None:
        tile_k = tile_n

    core_splits = max(1, int(core_splits))
    n_row_tiles_needed = -(-N // tile_n)
    tiles_per_core = -(-n_row_tiles_needed // core_splits)
    n_row_tiles = core_splits * tiles_per_core
    r_pad = n_row_tiles * tile_n
    n_col_tiles = -(-N // tile_k)
    c_pad = n_col_tiles * tile_k

    col_start_np, n_band = _column_band(adj_hat, N, tile_n, tile_k,
                                        n_row_tiles, n_col_tiles)
    col_start = jnp.asarray(col_start_np, dtype=jnp.int32)

    # Zero padding: padded adj rows/cols and pool columns are zero, so padded
    # nodes contribute nothing to the pooled result.
    adj_p = jnp.pad(adj_hat, ((0, r_pad - N), (0, c_pad - N))).astype(matmul_dtype)
    xw_p = jnp.pad(xw, ((0, c_pad - N), (0, 0))).astype(matmul_dtype)
    pool_p = jnp.pad(pool, ((0, 0), (0, r_pad - N))).astype(jnp.float32)
    shift1 = shift1.astype(jnp.float32)

    tpc = tiles_per_core
    grid = (core_splits, tiles_per_core, n_band)

    cost = pl.CostEstimate(
        flops=int(2 * r_pad * n_band * tile_k * H + 2 * G * r_pad * H),
        transcendentals=0,
        bytes_accessed=int(r_pad * n_band * tile_k * itemsize           # adj
                           + n_row_tiles * n_band * tile_k * H * itemsize  # xw
                           + G * r_pad * 4 + core_splits * G * H * 4),
    )

    partials = pl.pallas_call(
        drug_gnn_kernel,
        out_shape=jax.ShapeDtypeStruct((core_splits, G, H), jnp.float32),
        grid_spec=pltpu.PrefetchScalarGridSpec(
            num_scalar_prefetch=1,
            grid=grid,
            in_specs=[
                # adj: banded row/col tile stream (dominant HBM traffic).
                pl.BlockSpec(
                    (tile_n, tile_k),
                    lambda c, i, k, cs: (c * tpc + i, cs[c * tpc + i] + k)),
                # xw = x @ W1': matching banded column block.
                pl.BlockSpec(
                    (tile_k, H),
                    lambda c, i, k, cs: (cs[c * tpc + i] + k, 0)),
                # folded GCN bias + BN1 shift (f32, resident).
                pl.BlockSpec((1, H), lambda c, i, k, cs: (0, 0)),
                # mean-pool columns for this row block (kept f32).
                pl.BlockSpec((G, tile_n), lambda c, i, k, cs: (0, c * tpc + i)),
            ],
            out_specs=pl.BlockSpec((None, G, H), lambda c, i, k, cs: (c, 0, 0)),
            scratch_shapes=[pltpu.VMEM((tile_n, H), jnp.float32)],
        ),
        compiler_params=pltpu.CompilerParams(
            # c: independent per-core partial pools (megacore split on v7x);
            # i/k carry the pooled / column-band accumulation -> arbitrary.
            dimension_semantics=("parallel", "arbitrary", "arbitrary"),
            vmem_limit_bytes=vmem_limit,
        ),
        cost_estimate=cost,
    )(col_start, adj_p, xw_p, shift1, pool_p)

    # Tiny output head (Linear + BN2, folded) on the cross-core-summed pool.
    g = partials.sum(axis=0)                                      # [G, H]
    return jnp.dot(g, w2p, precision=hp) + shift2                 # [G, C]


# ----------------------------------------------------------------------------
# Graph densification (plain-JAX glue)
# ----------------------------------------------------------------------------
def build_gcn_adjacency(edge_index, num_nodes):
    """Dense D^{-1/2} (A + I) D^{-1/2}, matching PyG GCNConv defaults."""
    src, dst = edge_index
    A = jnp.zeros((num_nodes, num_nodes), jnp.float32)
    A = A.at[dst, src].add(1.0)                        # message j -> i at row i
    A = A + jnp.eye(num_nodes, dtype=jnp.float32)      # self loops
    deg = A.sum(axis=1)
    dinv = jnp.where(deg > 0, 1.0 / jnp.sqrt(deg), 0.0)
    return dinv[:, None] * A * dinv[None, :]


def build_pool_matrix(batch, num_graphs):
    onehot = (batch[None, :] == jnp.arange(num_graphs)[:, None]).astype(jnp.float32)
    counts = jnp.maximum(onehot.sum(axis=1, keepdims=True), 1.0)
    return onehot / counts                             # [G, N], rows sum to 1


def make_ring_batch(num_graphs, nodes_per_graph):
    src_list, dst_list = [], []
    for g in range(num_graphs):
        base = g * nodes_per_graph
        for i in range(nodes_per_graph):
            a = base + i
            b = base + (i + 1) % nodes_per_graph
            src_list += [a, b]
            dst_list += [b, a]
    edge_index = jnp.array([src_list, dst_list], dtype=jnp.int32)
    batch = jnp.repeat(jnp.arange(num_graphs, dtype=jnp.int32), nodes_per_graph)
    return edge_index, batch


# ----------------------------------------------------------------------------
# Pure-JAX references
# ----------------------------------------------------------------------------
def reference_forward(x, adj_hat, pool, params, eps=1e-5):
    """Unfolded math, exactly mirroring the PyTorch module in eval mode."""
    hp = jax.lax.Precision.HIGHEST
    h = jnp.dot(adj_hat, jnp.dot(x, params["w1"].T, precision=hp),
                precision=hp) + params["b1"]
    h = params["bn1_w"] * (h - params["bn1_rm"]) / jnp.sqrt(params["bn1_rv"] + eps) \
        + params["bn1_b"]
    h = jnp.maximum(h, 0.0)
    g = jnp.dot(pool, h, precision=hp)
    o = jnp.dot(g, params["w2"].T, precision=hp) + params["b2"]
    o = params["bn2_w"] * (o - params["bn2_rm"]) / jnp.sqrt(params["bn2_rv"] + eps) \
        + params["bn2_b"]
    return o


def reference_forward_prepped(x, adj_hat, pool, params, matmul_dtype):
    """Mirror the kernel's math (folded BN, precomputed xw, low-precision adj/xw
    operands, f32 accumulation, f32 pool) for the reduced-precision path."""
    hp = jax.lax.Precision.HIGHEST
    w1p, shift1, w2p, shift2 = _fold_params(params)
    xw = jnp.dot(x.astype(jnp.float32), w1p, precision=hp)

    def c(a):  # cast to matmul operand dtype, back to f32 (exact-product f32)
        return a.astype(matmul_dtype).astype(jnp.float32)

    t = jnp.dot(c(adj_hat), c(xw), precision=hp)
    h = jnp.maximum(t + shift1, 0.0)
    g = jnp.dot(pool.astype(jnp.float32), h, precision=hp)
    return jnp.dot(g, w2p, precision=hp) + shift2


# ----------------------------------------------------------------------------
# Main
# ----------------------------------------------------------------------------
if __name__ == "__main__":
    num_features = 8
    hidden_channels = 32
    num_classes = 4

    key = jax.random.PRNGKey(0)
    k_x, k_w1, k_w2, k_x2, k_e2, k_x3 = jax.random.split(key, 6)

    # Deterministic parameters matching _init_weights (eval-mode BN stats).
    params = {
        "w1": jax.random.uniform(k_w1, (hidden_channels, num_features),
                                 jnp.float32, -0.01, 0.01),
        "b1": jnp.zeros((hidden_channels,), jnp.float32),
        "bn1_w": jnp.full((hidden_channels,), 0.1, jnp.float32),
        "bn1_b": jnp.zeros((hidden_channels,), jnp.float32),
        "bn1_rm": jnp.zeros((hidden_channels,), jnp.float32),
        "bn1_rv": jnp.ones((hidden_channels,), jnp.float32),
        "w2": jax.random.uniform(k_w2, (num_classes, hidden_channels),
                                 jnp.float32, -0.01, 0.01),
        "b2": jnp.zeros((num_classes,), jnp.float32),
        "bn2_w": jnp.full((num_classes,), 0.1, jnp.float32),
        "bn2_b": jnp.zeros((num_classes,), jnp.float32),
        "bn2_rm": jnp.zeros((num_classes,), jnp.float32),
        "bn2_rv": jnp.ones((num_classes,), jnp.float32),
    }

    # ---- Test 1: two small ring graphs: f32 exact path + default bf16 path --
    num_graphs = 2
    nodes_per_graph = 8
    N = num_graphs * nodes_per_graph
    x = jax.random.normal(k_x, (N, num_features), jnp.float32)
    edge_index, batch = make_ring_batch(num_graphs, nodes_per_graph)
    adj_hat = build_gcn_adjacency(edge_index, N)
    pool = build_pool_matrix(batch, num_graphs)
    ref = reference_forward(x, adj_hat, pool, params)

    out_f32 = jax.block_until_ready(
        drug_gnn_forward(x, adj_hat, pool, params, matmul_dtype=jnp.float32))
    assert out_f32.shape == (num_graphs, num_classes)
    assert jnp.allclose(out_f32, ref, atol=1e-6, rtol=1e-3), "f32 path mismatch"

    out_bf16 = jax.block_until_ready(drug_gnn_forward(x, adj_hat, pool, params))
    ref_bf16 = reference_forward_prepped(x, adj_hat, pool, params, jnp.bfloat16)
    assert jnp.allclose(out_bf16, ref_bf16, atol=1e-6, rtol=1e-3), \
        "bf16 path mismatch vs prepped reference"
    assert jnp.allclose(out_bf16, ref, atol=1e-6, rtol=5e-2), \
        "bf16 path too far from exact reference"

    # ---- Test 2: larger random graph (cross-graph edges -> full column band,
    #              multi row/col tile accumulation), f32 exact ----------------
    num_graphs2 = 3
    nodes_per_graph2 = 100
    N2 = num_graphs2 * nodes_per_graph2
    num_edges2 = 1200
    x2 = jax.random.normal(k_x2, (N2, num_features), jnp.float32)
    edge_index2 = jax.random.randint(k_e2, (2, num_edges2), 0, N2, dtype=jnp.int32)
    batch2 = jnp.repeat(jnp.arange(num_graphs2, dtype=jnp.int32), nodes_per_graph2)
    adj_hat2 = build_gcn_adjacency(edge_index2, N2)
    pool2 = build_pool_matrix(batch2, num_graphs2)

    out2 = jax.block_until_ready(
        drug_gnn_forward(x2, adj_hat2, pool2, params, tile_n=128, tile_k=128,
                         matmul_dtype=jnp.float32))
    ref2 = reference_forward(x2, adj_hat2, pool2, params)
    assert out2.shape == (num_graphs2, num_classes)
    assert jnp.allclose(out2, ref2, atol=1e-6, rtol=1e-3), "multi-tile mismatch"

    # ---- Test 3: block-diagonal batch -> banded column skipping is active ---
    num_graphs3 = 4
    nodes_per_graph3 = 64
    N3 = num_graphs3 * nodes_per_graph3           # 256 nodes, 2 row/col tiles
    x3 = jax.random.normal(k_x3, (N3, num_features), jnp.float32)
    edge_index3, batch3 = make_ring_batch(num_graphs3, nodes_per_graph3)
    adj_hat3 = build_gcn_adjacency(edge_index3, N3)
    pool3 = build_pool_matrix(batch3, num_graphs3)

    out3 = jax.block_until_ready(
        drug_gnn_forward(x3, adj_hat3, pool3, params, tile_n=128, tile_k=128,
                         matmul_dtype=jnp.float32))
    ref3 = reference_forward(x3, adj_hat3, pool3, params)
    assert out3.shape == (num_graphs3, num_classes)
    assert jnp.allclose(out3, ref3, atol=1e-6, rtol=1e-3), "banded-skip mismatch"

    print("KERNEL_OK")
</pallas_src>

<mosaic_0001>
module attributes {stable_mosaic.version = 11 : i64} {
  func.func @drug_gnn_kernel(%arg0: i32, %arg1: i32, %arg2: i32, %arg3: memref<2xi32, #tpu.memory_space<smem>>, %arg4: memref<128x128xf32, #tpu.memory_space<vmem>>, %arg5: memref<128x32xf32, #tpu.memory_space<vmem>>, %arg6: memref<1x32xf32, #tpu.memory_space<vmem>>, %arg7: memref<2x128xf32, #tpu.memory_space<vmem>>, %arg8: memref<1x2x32xf32, #tpu.memory_space<vmem>>, %arg9: memref<128x32xf32, #tpu.memory_space<vmem>>) attributes {dimension_semantics = [#tpu.dimension_semantics<parallel>, #tpu.dimension_semantics<arbitrary>, #tpu.dimension_semantics<arbitrary>], iteration_bounds = array<i64: 2, 1, 1>, scalar_prefetch = 1 : i64, scratch_operands = 1 : i64, tpu.core_type = #tpu.core_type<tc>, window_params = [{transform_indices = @transform_0, window_bounds = array<i64: 128, 128>}, {transform_indices = @transform_1, window_bounds = array<i64: 128, 32>}, {pipeline_mode = #tpu.pipeline_mode<synchronous>, transform_indices = @transform_2, window_bounds = array<i64: 1, 32>}, {transform_indices = @transform_3, window_bounds = array<i64: 2, 128>}, {transform_indices = @transform_4, window_bounds = array<i64: 1, 2, 32>}]} {
    %c0_i32 = arith.constant 0 : i32
    %0 = arith.cmpi eq, %arg1, %c0_i32 : i32
    %c0_i32_0 = arith.constant 0 : i32
    %1 = arith.cmpi eq, %arg2, %c0_i32_0 : i32
    %2 = arith.andi %0, %1 : i1
    %3 = arith.extui %2 : i1 to i32
    %c0_i32_1 = arith.constant 0 : i32
    %4 = arith.cmpi ne, %3, %c0_i32_1 : i32
    scf.if %4 {
      %cst_13 = arith.constant 0.000000e+00 : f32
      %17 = vector.broadcast %cst_13 : f32 to vector<2x32xf32>
      %c0_14 = arith.constant 0 : index
      %c0_15 = arith.constant 0 : index
      %c0_16 = arith.constant 0 : index
      %18 = vector.load %arg8[%c0_14, %c0_15, %c0_16] : memref<1x2x32xf32, #tpu.memory_space<vmem>>, vector<1x2x32xf32>
      %19 = vector.shape_cast %18 : vector<1x2x32xf32> to vector<2x32xf32>
      %20 = vector.shape_cast %17 : vector<2x32xf32> to vector<1x2x32xf32>
      tpu.vector_store %arg8[%c0_14, %c0_15, %c0_16], %20 {strides = array<i32>} : memref<1x2x32xf32, #tpu.memory_space<vmem>>, vector<1x2x32xf32>,
    } else {
    }
    %c0_i32_2 = arith.constant 0 : i32
    %5 = arith.cmpi eq, %arg2, %c0_i32_2 : i32
    %6 = arith.extui %5 : i1 to i32
    %c0_i32_3 = arith.constant 0 : i32
    %7 = arith.cmpi ne, %6, %c0_i32_3 : i32
    scf.if %7 {
      %cst_13 = arith.constant 0.000000e+00 : f32
      %17 = vector.broadcast %cst_13 : f32 to vector<128x32xf32>
      %c0_14 = arith.constant 0 : index
      %c0_15 = arith.constant 0 : index
      %18 = vector.load %arg9[%c0_14, %c0_15] : memref<128x32xf32, #tpu.memory_space<vmem>>, vector<128x32xf32>
      tpu.vector_store %arg9[%c0_14, %c0_15], %17 {strides = array<i32>} : memref<128x32xf32, #tpu.memory_space<vmem>>, vector<128x32xf32>,
    } else {
    }
    %c0 = arith.constant 0 : index
    %c0_4 = arith.constant 0 : index
    %8 = vector.load %arg9[%c0, %c0_4] : memref<128x32xf32, #tpu.memory_space<vmem>>, vector<128x32xf32>
    %c0_5 = arith.constant 0 : index
    %c0_6 = arith.constant 0 : index
    %9 = vector.load %arg4[%c0_5, %c0_6] : memref<128x128xf32, #tpu.memory_space<vmem>>, vector<128x128xf32>
    %c0_7 = arith.constant 0 : index
    %c0_8 = arith.constant 0 : index
    %10 = vector.load %arg5[%c0_7, %c0_8] : memref<128x32xf32, #tpu.memory_space<vmem>>, vector<128x32xf32>
    %cst = arith.constant dense<0.000000e+00> : vector<128x32xf32>
    %11 = tpu.matmul %9, %10, %cst {dimension_numbers = #tpu.dot_dimension_numbers<[1], [0], [0], [1], [0, 0, 1, 1], [], []>} : vector<128x128xf32>, vector<128x32xf32>, vector<128x32xf32> -> vector<128x32xf32>
    %12 = arith.addf %8, %11 : vector<128x32xf32>
    %c0_9 = arith.constant 0 : index
    %c0_10 = arith.constant 0 : index
    %13 = vector.load %arg9[%c0_9, %c0_10] : memref<128x32xf32, #tpu.memory_space<vmem>>, vector<128x32xf32>
    tpu.vector_store %arg9[%c0_9, %c0_10], %12 {strides = array<i32>} : memref<128x32xf32, #tpu.memory_space<vmem>>, vector<128x32xf32>,
    %c0_i32_11 = arith.constant 0 : i32
    %14 = arith.cmpi eq, %arg2, %c0_i32_11 : i32
    %15 = arith.extui %14 : i1 to i32
    %c0_i32_12 = arith.constant 0 : i32
    %16 = arith.cmpi ne, %15, %c0_i32_12 : i32
    scf.if %16 {
      %c0_13 = arith.constant 0 : index
      %c0_14 = arith.constant 0 : index
      %17 = vector.load %arg9[%c0_13, %c0_14] : memref<128x32xf32, #tpu.memory_space<vmem>>, vector<128x32xf32>
      %c0_15 = arith.constant 0 : index
      %c0_16 = arith.constant 0 : index
      %18 = vector.load %arg6[%c0_15, %c0_16] : memref<1x32xf32, #tpu.memory_space<vmem>>, vector<1x32xf32>
      %19 = vector.broadcast %18 : vector<1x32xf32> to vector<128x32xf32>
      %20 = arith.addf %17, %19 : vector<128x32xf32>
      %cst_17 = arith.constant 0.000000e+00 : f32
      %21 = vector.broadcast %cst_17 : f32 to vector<128x32xf32>
      %22 = arith.maximumf %20, %21 : vector<128x32xf32>
      %c0_18 = arith.constant 0 : index
      %c0_19 = arith.constant 0 : index
      %c0_20 = arith.constant 0 : index
      %23 = vector.load %arg8[%c0_18, %c0_19, %c0_20] : memref<1x2x32xf32, #tpu.memory_space<vmem>>, vector<1x2x32xf32>
      %24 = vector.shape_cast %23 : vector<1x2x32xf32> to vector<2x32xf32>
      %c0_21 = arith.constant 0 : index
      %c0_22 = arith.constant 0 : index
      %25 = vector.load %arg7[%c0_21, %c0_22] : memref<2x128xf32, #tpu.memory_space<vmem>>, vector<2x128xf32>
      %cst_23 = arith.constant dense<0.000000e+00> : vector<2x32xf32>
      %26 = tpu.matmul %25, %22, %cst_23 {dimension_numbers = #tpu.dot_dimension_numbers<[1], [0], [0], [1], [0, 0, 1, 1], [], []>} : vector<2x128xf32>, vector<128x32xf32>, vector<2x32xf32> -> vector<2x32xf32>
      %27 = arith.addf %24, %26 : vector<2x32xf32>
      %c0_24 = arith.constant 0 : index
      %c0_25 = arith.constant 0 : index
      %c0_26 = arith.constant 0 : index
      %28 = vector.load %arg8[%c0_24, %c0_25, %c0_26] : memref<1x2x32xf32, #tpu.memory_space<vmem>>, vector<1x2x32xf32>
      %29 = vector.shape_cast %28 : vector<1x2x32xf32> to vector<2x32xf32>
      %30 = vector.shape_cast %27 : vector<2x32xf32> to vector<1x2x32xf32>
      tpu.vector_store %arg8[%c0_24, %c0_25, %c0_26], %30 {strides = array<i32>} : memref<1x2x32xf32, #tpu.memory_space<vmem>>, vector<1x2x32xf32>,
    } else {
    }
    return
  }
  func.func @transform_0(%arg0: i32, %arg1: i32, %arg2: i32, %arg3: memref<2xi32, #tpu.memory_space<smem>>) -> (i32, i32) {
    %c1_i32 = arith.constant 1 : i32
    %0 = arith.muli %arg0, %c1_i32 : i32
    %1 = arith.addi %0, %arg1 : i32
    %c1_i32_0 = arith.constant 1 : i32
    %2 = arith.muli %arg0, %c1_i32_0 : i32
    %3 = arith.addi %2, %arg1 : i32
    %4 = arith.index_cast %3 : i32 to index
    %5 = memref.load %arg3[%4] : memref<2xi32, #tpu.memory_space<smem>>
    %6 = arith.addi %5, %arg2 : i32
    %c0_i32 = arith.constant 0 : i32
    return %1, %6 : i32, i32
  }
  func.func @transform_1(%arg0: i32, %arg1: i32, %arg2: i32, %arg3: memref<2xi32, #tpu.memory_space<smem>>) -> (i32, i32) {
    %c1_i32 = arith.constant 1 : i32
    %0 = arith.muli %arg0, %c1_i32 : i32
    %1 = arith.addi %0, %arg1 : i32
    %2 = arith.index_cast %1 : i32 to index
    %3 = memref.load %arg3[%2] : memref<2xi32, #tpu.memory_space<smem>>
    %4 = arith.addi %3, %arg2 : i32
    %c0_i32 = arith.constant 0 : i32
    %c0_i32_0 = arith.constant 0 : i32
    return %4, %c0_i32 : i32, i32
  }
  func.func @transform_2(%arg0: i32, %arg1: i32, %arg2: i32, %arg3: memref<2xi32, #tpu.memory_space<smem>>) -> (i32, i32) {
    %c0_i32 = arith.constant 0 : i32
    %c0_i32_0 = arith.constant 0 : i32
    %c0_i32_1 = arith.constant 0 : i32
    return %c0_i32, %c0_i32_0 : i32, i32
  }
  func.func @transform_3(%arg0: i32, %arg1: i32, %arg2: i32, %arg3: memref<2xi32, #tpu.memory_space<smem>>) -> (i32, i32) {
    %c1_i32 = arith.constant 1 : i32
    %0 = arith.muli %arg0, %c1_i32 : i32
    %1 = arith.addi %0, %arg1 : i32
    %c0_i32 = arith.constant 0 : i32
    %c0_i32_0 = arith.constant 0 : i32
    return %c0_i32, %1 : i32, i32
  }
  func.func @transform_4(%arg0: i32, %arg1: i32, %arg2: i32, %arg3: memref<2xi32, #tpu.memory_space<smem>>) -> (i32, i32, i32) {
    %c0_i32 = arith.constant 0 : i32
    %c0_i32_0 = arith.constant 0 : i32
    %c0_i32_1 = arith.constant 0 : i32
    return %arg0, %c0_i32, %c0_i32_0 : i32, i32, i32
  }
}

</mosaic_0001>

<bundles_post_ra>
// kernel: tpu_custom_call.1
= control target key start
LH: loop header
LB: loop body
LE: loop exit
PB: predicated region body
PF: predicated region fallthrough
CT: control target
= control target key end

     0   :  { %s1678_s0 = inlined_call_operand.vmem [shape: s32[2], index: 0, kind: input, shape index: {}]   ;;  %s1679_s1 = inlined_call_operand.hbm [shape: f32[256,128], index: 1, kind: input, shape index: {}]   ;;  %s1680_s2 = inlined_call_operand.vmem [shape: f32[128,32], index: 2, kind: input, shape index: {}]   ;;  %s1681_s3 = inlined_call_operand.vmem [shape: f32[1,32], index: 3, kind: input, shape index: {}]   ;;  %s1682_s4 = inlined_call_operand.vmem [shape: f32[2,256], index: 4, kind: input, shape index: {}]   ;;  %s1683_s5 = inlined_call_operand.hbm [shape: f32[2,2,32], index: 5, kind: output, shape index: {}]  }
   0x1   :  { %s10_s20 = sshll.u32 %s1678_s0, 4  ;;  %s11_s20 = int_to_ptr.vmem [resolvable:$true] %s10_s20 }
   0x2   :  { %s1145_s21 = scalar_lea.vmem %s11_s20, 16  ;;  %p1150_p1 = scmp.lt.s32.totalorder %s11_s20, %s11_s20 }
   0x3   :  { %p1146_p0 = scmp.ne.s32.totalorder %s11_s20, %s1145_s21  ;;  %p1151_p2 = scmp.lt.s32.totalorder %s1145_s21, %s1145_s21 }
   0x5   :  { %p1152_p3 = por %p1151_p2, %p1150_p1 }
   0x7   :  { %p1153_p4 = pnand %p1152_p3, %p1146_p0 }
   0x9   :  { %1156 = shalt.err (!%p1153_p4)  }
   0xa   :  { %s1297_s22 = smov [#allocation4]  }
   0xb   :  { %13 = dma.vmem_to_smem %s11_s20, 16, %s1297_s22, [#allocation3] }
   0xc   :  { %1251 = dma.done.wait [#allocation3], 16 }
   0xd   :  { %1252 = vsyncadd [#allocation3], 4294967280 }
   0xe   :  { %15 = sfence }
   0xf   :  { %16 = vsyncpa [#allocation6], 0 }
  0x10   :  { %18 = vsyncpa [#allocation6 + $0x1], 0 }
  0x11   :  { %19 = vsyncpa [#allocation7], 0 }
  0x12   :  { %21 = vsyncpa [#allocation7 + $0x1], 0  ;;  %s1338_s23 = smov 0   ;;  %s1340_s0 = smov 0  }
  0x13   :  { %s1342_s24 = smov 0   ;;  %s1344_s25 = smov 0  }
  0x14   :  { %s1346_s26 = smov 0   ;;  %s1348_s27 = smov 0  }
  0x15   :  { %s1350_s28 = smov 0   ;;  %s1352_s29 = smov 0  }
  0x16   :  { %s1354_s30 = smov 0  }
  0x17 LB: > { %1688 = sst [smem:[#allocation14_spill]] %s1283_s27  ;;  %s835_s6 = sadd.s32 4294967295, %s1295_s30   ;;  %s1295_s30 = sphi %s1354_s30, %s27_s30   ;;  %s1291_s29 = sphi %s1352_s29, %s1709_s29   ;;  %s1287_s28 = sphi %s1350_s28, %s1708_s28   ;;  %s1283_s27 = sphi %s1348_s27, %s1701_s27   ;;  %s1279_s26 = sphi %s1346_s26, %s1707_s26   ;;  %s1275_s25 = sphi %s1344_s25, %s1706_s25   ;;  %s1271_s24 = sphi %s1342_s24, %s1705_s24   ;;  %s1267_s0 = sphi %s1340_s0, %s1704_s0   ;;  %s1263_s23 = sphi %s1338_s23, %s1703_s23  }
  0x18   : > { %s836_s7 = sadd.s32 4294967294, %s1295_s30   ;;  %s46_s8 = sadd.s32 1, %s1291_s29 }
  0x19   : > { %p48_p5 = scmp.ge.s32.totalorder %s46_s8, 2  ;;  %s51_s9 = sld [smem:[#allocation4 + %s1291_s29]] }
  0x1a   : > { %s61_s10 = sadd.s32 1, %s1283_s27  ;;  %p68_p6 = scmp.ne.s32.totalorder %s1283_s27, %s1279_s26 }
  0x1b   : > { %s1711_s8 = smov (%p48_p5, %s46_s8), 0  ;;  %p69_p7 = scmp.eq.s32.totalorder %s1295_s30, 0 }
  0x1c   : > { %1689 = sst [smem:[#allocation15_spill]] %s1711_s8  ;;  %p74_p8 = scmp.ne.s32.totalorder %s1279_s26, %s1275_s25 }
  0x1d   : > { %s54_s11 = sld [smem:[#allocation4 + %s1711_s8]]  ;;  %s56_s12 = ssub.s32 %s1291_s29, %s1711_s8 }
  0x1e   : > { %p75_p9 = scmp.eq.s32.totalorder %s835_s6, 0  ;;  %p166_p10 = scmp.eq.s32.totalorder %s56_s12, 0 }
  0x1f   : > { %s168_s13 = sadd.s32 1, %s1271_s24  ;;  %p178_p11 = scmp.ne.s32.totalorder %s1271_s24, %s1267_s0 }
  0x20   : > { %p1398_p12 = por %p75_p9, %p74_p8  ;;  %p179_p13 = scmp.eq.s32.totalorder %s835_s6, 1 }
  0x21   : > { %s1403_s15 = scalar_select %p166_p10, %s1271_s24, %s168_s13  }
  0x22   : > { %s1690_s14 = scalar_select %p1398_p12, 1, 0 }
  0x23   : > { %p1405_p0 = por %p179_p13, %p178_p11  ;;  %p184_p1 = scmp.ne.s32.totalorder %s1267_s0, %s1263_s23 }
  0x24   : > { %s57_s17 = ssub.s32 %s51_s9, %s54_s11  ;;  %p185_p2 = scmp.eq.s32.totalorder %s836_s7, 1 }
  0x25   : > { %s1691_s16 = scalar_select %p1405_p0, 1, 0 }
  0x26   : > { %s58_s18 = sor.u32 %s57_s17, %s56_s12  ;;  %p1412_p5 = por %p185_p2, %p184_p1 }
  0x27   : > { %p59_p4 = scmp.eq.s32.totalorder %s58_s18, 0  ;;  %p70_p8 = por %p69_p7, %p68_p6 }
  0x28   : > { %s1692_s19 = scalar_select %p1412_p5, 1, 0 }
  0x29   : > { %s208_s20 = sand.u32 1, %s1283_s27   ;;  %p1065_p9 = scmp.lt.s32.totalorder %s1295_s30, 2 }
  0x2a   : > { %s1423_s21 = scalar_select %p59_p4, %s1283_s27, %s61_s10  }
  0x2b   : > { %s839_s22 = sshll.u32 %s208_s20, 7  ;;  %p1427_p10 = pnand %p1065_p9, %p70_p8 }
  0x2c   : > { %1693 = sst [smem:[#allocation16_spill]] %s1423_s21  ;;  %s212_s11 = scalar_lea.vmem [#allocation5], %s839_s22 }
  0x2d   : > { %s1049_s25 = scalar_select %p70_p8, [#allocation4], [#allocation9] }
  0x2e   : > { %s1050_s6 = scalar_select %p70_p8, %s1291_s29, 0 }
  0x2f   : > { %s1713_s25 = smov (!%p1065_p9, %s1049_s25), [#allocation10]  ;;  %s223_s12 = sshll.u32 %s212_s11, 4  ;;  %s1434_s12 = int_to_ptr.vmem [resolvable:$true] %s223_s12 }
  0x30   : > { %s1715_s6 = smov (!%p1065_p9, %s1050_s6), 0  ;;  %p842_p11 = scmp.ge.s32.totalorder %s1295_s30, 1 }
  0x31   : > { %s214_s9 = sld [smem:[%s1713_s25 + %s1715_s6]]  ;;  %s840_s13 = sshll.u32 %s1291_s29, 4 }
  0x32   : > { %p255_p6 = scmp.lt.s32.totalorder %s1295_s30, 3  ;;  %s1445_s22 = scalar_lea.sflag [#allocation6], %s208_s20 }
  0x33   : > { %p1159_p1 = pneg %p1427_p10  ;;  %s1162_s8 = scalar_lea.hbm %s1679_s1, 4096 }
  0x34   : > { %p1436_p7 = pnand %p842_p11, %p255_p6 }
  0x37   : > { %s220_s17 = sadd.s32 %s840_s13, %s214_s9 }
  0x38   : > { %s841_s18 = sshll.u32 %s220_s17, 7 }
  0x39   : > { %s1443_s27 = scalar_lea.hbm %s1679_s1, %s841_s18 }
  0x3a   : > { %s1157_s25 = scalar_lea.hbm %s1443_s27, 2048  ;;  %p1163_p8 = scmp.lt.u32.totalorder %s1443_s27, %s1679_s1 }
  0x3b   : > { %p1158_p13 = scmp.ne.s32.totalorder %s1443_s27, %s1157_s25  ;;  %p1164_p9 = scmp.lt.u32.totalorder %s1162_s8, %s1157_s25 }
  0x3c   : > { %p1166_p6 = scmp.lt.u32.totalorder %s1157_s25, %s1443_s27 }
  0x3d   : > { %p1160_p2 = pnand %p1159_p1, %p1158_p13  ;;  %p1165_p11 = por %p1164_p9, %p1163_p8 }
  0x3f   : > { %p1161_p4 = pneg %p1160_p2  ;;  %p1167_p3 = por %p1166_p6, %p1165_p11 }
  0x41   : > { %p1168_p5 = pnand %p1167_p3, %p1161_p4 }
  0x43   : > { %1171 = shalt.err (!%p1168_p5)
}
  0x44   : > { %s1172_s20 = scalar_lea.vmem %s1434_s12, 2048  ;;  %s1298_s13 = smov [#allocation5]  }
  0x45   : > { %p1173_p13 = scmp.ne.s32.totalorder %s1434_s12, %s1172_s20  ;;  %s1177_s17 = sshll.u32 %s1298_s13, 4  ;;  %s1178_s17 = int_to_ptr.vmem [resolvable:$false] %s1177_s17 }
  0x46   : > { %s1179_s18 = scalar_lea.vmem %s1178_s17, 4096  ;;  %p1180_p12 = scmp.lt.s32.totalorder %s1434_s12, %s1178_s17 }
  0x47   : > { %p1175_p2 = pnand %p1173_p13, %p1159_p1  ;;  %p1181_p8 = scmp.lt.s32.totalorder %s1179_s18, %s1172_s20 }
  0x49   : > { %p1176_p0 = pneg %p1175_p2  ;;  %p1182_p9 = por %p1181_p8, %p1180_p12 }
  0x4b   : > { %p1183_p11 = pnand %p1182_p9, %p1176_p0 }
  0x4d   : > { %1186 = shalt.err (!%p1183_p11)
}
  0x4e   : > { %s1299_s25 = smov 128   ;;  %s1300_s6 = smov 8  }
  0x4f   : > { %1060 = dma.hbm_to_vmem [thread:$0]  (!%p1427_p10), %s1443_s27, 2048, %s1434_s12, %s1445_s22, %s1299_s25, %s1299_s25, %s1300_s6  }
  0x50   : > { %259 = sbr.rel (%p1436_p7) target bundleno = 623 (0x26f), region = 36  ;;  %s261_s9 = sand.u32 (!%p1436_p7), 1, %s1279_s26  }
  0x51   : > { %s843_s8 = sshll.u32 (!%p1436_p7), %s261_s9, 7  ;;  %s262_s21 = scalar_lea.sflag (!%p1436_p7), [#allocation6], %s261_s9 }
  0x52   : > { %s1476_s11 = scalar_lea.vmem (!%p1436_p7), [#allocation5], %s843_s8  ;;  %p1696_p12 = scmp.ne.s32.totalorder (!%p1436_p7), %s1690_s14, 0 }
  0x57   : > { %1254 = dma.done.wait (%p1696_p12), %s262_s21, 2048  }
  0x58   : > { %1256 = vsyncadd (%p1696_p12), %s262_s21, 4294965248  ;;  %vm336_vm0 = vcmask 261120   ;;  %s308_s20 = sld [smem:[#allocation4 + %s1287_s28]]  ;;  %v1301_v0 = vmov 0.0   ;;  %v369_v1 = vld [vmem:[%s1476_s11] sm:$0xff]  ;;  %v370_v26 = vld [vmem:[%s1476_s11 + $0x8] sm:$0xff] }
  0x59   : > { %338 = vst.msk [vmem:[#allocation2 + $0x8] sm:$0xff] %vm336_vm0, %v1301_v0  ;;  %337 = vst.msk [vmem:[#allocation2] sm:$0xff] %vm336_vm0, %v1301_v0  ;;  %934 = vmatprep.mubr.f32.mxu0 %v369_v1  ;;  %v371_v27 = vld [vmem:[%s1476_s11 + $0x10] sm:$0xff]  ;;  %v372_v28 = vld [vmem:[%s1476_s11 + $0x18] sm:$0xff]  ;;  %v1302_v41 = vmov 0.0|0.0   ;;  %vm1303_vm1 = vmmov 0  }
  0x5a   : > { %339 = vst.msk [vmem:[#allocation2 + $0x10] sm:$0xff] %vm336_vm0, %v1301_v0  ;;  %340 = vst.msk [vmem:[#allocation2 + $0x18] sm:$0xff] %vm336_vm0, %v1301_v0  ;;  %v373_v29 = vld [vmem:[%s1476_s11 + $0x20] sm:$0xff]  ;;  %v374_v30 = vld [vmem:[%s1476_s11 + $0x28] sm:$0xff]  ;;  %1025 = vmatprep.subr.bf16.mxu1 %v1302_v41  ;;  %990 = vmatprep.mubr.msk.f32.mxu1 %vm1303_vm1, %v1301_v0  ;;  %s300_s22 = sand.u32 1, %s1267_s0   ;;  %vm331_vm2 = vcmask 254976  }
  0x5b   : > { %341 = vst.msk [vmem:[#allocation2 + $0x20] sm:$0xff] %vm336_vm0, %v1301_v0  ;;  %342 = vst.msk [vmem:[#allocation2 + $0x28] sm:$0xff] %vm336_vm0, %v1301_v0  ;;  %v375_v31 = vld [vmem:[%s1476_s11 + $0x30] sm:$0xff]  ;;  %v376_v32 = vld [vmem:[%s1476_s11 + $0x38] sm:$0xff]  ;;  %s844_s13 = sshll.u32 %s300_s22, 1  ;;  %p320_p3 = scmp.lt.s32.totalorder %s1287_s28, 1 }
  0x5c   : > { %343 = vst.msk [vmem:[#allocation2 + $0x30] sm:$0xff] %vm336_vm0, %v1301_v0  ;;  %344 = vst.msk [vmem:[#allocation2 + $0x38] sm:$0xff] %vm336_vm0, %v1301_v0  ;;  %v377_v33 = vld [vmem:[%s1476_s11 + $0x40] sm:$0xff]  ;;  %v378_v34 = vld [vmem:[%s1476_s11 + $0x48] sm:$0xff]  ;;  %s1557_s17 = scalar_lea.vmem [#allocation8], %s844_s13  ;;  %p1697_p10 = scmp.ne.s32.totalorder %s1691_s16, 0 }
  0x5d   : > { %345 = vst.msk [vmem:[#allocation2 + $0x40] sm:$0xff] %vm336_vm0, %v1301_v0  ;;  %346 = vst.msk [vmem:[#allocation2 + $0x48] sm:$0xff] %vm336_vm0, %v1301_v0  ;;  %v379_v35 = vld [vmem:[%s1476_s11 + $0x50] sm:$0xff]  ;;  %v380_v36 = vld [vmem:[%s1476_s11 + $0x58] sm:$0xff]  ;;  %s321_s6 = scalar_select %p320_p3, %s1287_s28, 1 }
  0x5e   : > { %347 = vst.msk [vmem:[#allocation2 + $0x50] sm:$0xff] %vm336_vm0, %v1301_v0  ;;  %348 = vst.msk [vmem:[#allocation2 + $0x58] sm:$0xff] %vm336_vm0, %v1301_v0  ;;  %s845_s27 = sshll.u32 %s308_s20, 4  ;;  %v381_v37 = vld [vmem:[%s1476_s11 + $0x60] sm:$0xff]  ;;  %v382_v38 = vld [vmem:[%s1476_s11 + $0x68] sm:$0xff]  ;;  %s850_s20 = sshll.u32 %s1287_s28, 5 }
  0x5f   : > { %349 = vst.msk [vmem:[#allocation2 + $0x60] sm:$0xff] %vm336_vm0, %v1301_v0  ;;  %350 = vst.msk [vmem:[#allocation2 + $0x68] sm:$0xff] %vm336_vm0, %v1301_v0  ;;  %p311_p0 = scmp.lt.s32.totalorder %s845_s27, 15  ;;  %v383_v39 = vld [vmem:[%s1476_s11 + $0x70] sm:$0xff]  ;;  %v384_v40 = vld [vmem:[%s1476_s11 + $0x78] sm:$0xff]  ;;  %s847_s9 = sshll.u32 %s321_s6, 1 }
  0x60   : > { %351 = vst.msk [vmem:[#allocation2 + $0x70] sm:$0xff] %vm336_vm0, %v1301_v0  ;;  %352 = vst.msk [vmem:[#allocation2 + $0x78] sm:$0xff] %vm336_vm0, %v1301_v0  ;;  %v354_v42 = vld [vmem:[#allocation2 + $0x8] sm:$0xff]  ;;  %v353_v43 = vld [vmem:[#allocation2] sm:$0xff]  ;;  %s323_s11 = scalar_lea.vmem %s1682_s4, %s847_s9  ;;  %s1617_s12 = scalar_lea.hbm %s1683_s5, %s850_s20 }
  0x61   : > { %s1717_s27 = smov (!%p311_p0, %s845_s27), 15  ;;  %332 = vst.msk [vmem:[%s1557_s17] sm:$0x3] %vm331_vm2, %v1301_v0  ;;  %v356_v48 = vld [vmem:[#allocation2 + $0x18] sm:$0xff]  ;;  %v355_v49 = vld [vmem:[#allocation2 + $0x10] sm:$0xff]  ;;  %s1304_s28 = smov [#allocation8]  }
  0x62   : > { %s846_s14 = sshll.u32 %s1717_s27, 3  ;;  %v358_v54 = vld [vmem:[#allocation2 + $0x28] sm:$0xff]  ;;  %v357_v55 = vld [vmem:[#allocation2 + $0x20] sm:$0xff]  ;;  %s726_s27 = sshll.u32 %s1557_s17, 4  ;;  %s1619_s27 = int_to_ptr.vmem [resolvable:$true] %s726_s27 }
  0x63   : > { %s1519_s10 = scalar_lea.vmem %s1680_s2, %s846_s14  ;;  %v1569_v57 = vld [vmem:[%s1681_s3] ss:$0 sm:$0xff]  ;;  %v360_v61 = vld [vmem:[#allocation2 + $0x38] sm:$0xff]  ;;  %v359_v63 = vld [vmem:[#allocation2 + $0x30] sm:$0xff]  ;;  %s1187_s13 = scalar_lea.vmem %s1619_s27, 32 }
  0x64   : > { %v385_v2 = vld [vmem:[%s1519_s10] sm:$0xff]  ;;  %v386_v3 = vld [vmem:[%s1519_s10 + $0x8] sm:$0xff]  ;;  %v387_v4 = vld [vmem:[%s1519_s10 + $0x10] sm:$0xff]  ;;  %p1188_p5 = scmp.ne.s32.totalorder %s1619_s27, %s1187_s13  ;;  %s1191_s18 = sshll.u32 %s1304_s28, 4  ;;  %s1192_s18 = int_to_ptr.vmem [resolvable:$false] %s1191_s18 }
  0x65   : > { %v993_v5 = vpack.c.bf16 %v386_v3, %v385_v2  ;;  %v388_v6 = vld [vmem:[%s1519_s10 + $0x18] sm:$0xff]  ;;  %v389_v8 = vld [vmem:[%s1519_s10 + $0x20] sm:$0xff]  ;;  %v390_v9 = vld [vmem:[%s1519_s10 + $0x28] sm:$0xff]  ;;  %s1193_s25 = scalar_lea.vmem %s1192_s18, 64  ;;  %p1194_p4 = scmp.lt.s32.totalorder %s1619_s27, %s1192_s18 }
  0x66   : > { %v997_v7 = vpack.c.bf16 %v388_v6, %v387_v4  ;;  %v1001_v10 = vpack.c.bf16 %v390_v9, %v389_v8  ;;  %v391_v11 = vld [vmem:[%s1519_s10 + $0x30] sm:$0xff]  ;;  %v392_v12 = vld [vmem:[%s1519_s10 + $0x38] sm:$0xff]  ;;  %v393_v14 = vld [vmem:[%s1519_s10 + $0x40] sm:$0xff]  ;;  %p1189_p7 = pnand %p1188_p5, %p1697_p10  ;;  %p1195_p6 = scmp.lt.s32.totalorder %s1193_s25, %s1187_s13 }
  0x67   : > { %994 = vmatprep.subr.bf16.mxu0 %v993_v5  ;;  %v1005_v13 = vpack.c.bf16 %v392_v12, %v391_v11  ;;  %v394_v15 = vld [vmem:[%s1519_s10 + $0x48] sm:$0xff]  ;;  %v395_v17 = vld [vmem:[%s1519_s10 + $0x50] sm:$0xff]  ;;  %v396_v18 = vld [vmem:[%s1519_s10 + $0x58] sm:$0xff] }
  0x68   : > { %996 = vmatpush3.bf16.msra.mxu0 %v993_v5  ;;  %v1009_v16 = vpack.c.bf16 %v394_v15, %v393_v14  ;;  %v1013_v19 = vpack.c.bf16 %v396_v18, %v395_v17  ;;  %v397_v20 = vld [vmem:[%s1519_s10 + $0x60] sm:$0xff]  ;;  %v398_v21 = vld [vmem:[%s1519_s10 + $0x68] sm:$0xff]  ;;  %v399_v23 = vld [vmem:[%s1519_s10 + $0x70] sm:$0xff]  ;;  %p1190_p1 = pneg %p1189_p7  ;;  %p1196_p13 = por %p1195_p6, %p1194_p4 }
  0x69   : > { %998 = vmatprep.subr.bf16.mxu0 %v997_v7  ;;  %v1017_v22 = vpack.c.bf16 %v398_v21, %v397_v20  ;;  %v400_v24 = vld [vmem:[%s1519_s10 + $0x78] sm:$0xff]  ;;  %v362_v8 = vld [vmem:[#allocation2 + $0x48] sm:$0xff]  ;;  %v361_v11 = vld [vmem:[#allocation2 + $0x40] sm:$0xff]  ;;  %s713_s10 = scalar_lea.sflag [#allocation7], %s300_s22 }
  0x6a   : > { %v1021_v25 = vpack.c.bf16 %v400_v24, %v399_v23  ;;  %v364_v21 = vld [vmem:[#allocation2 + $0x58] sm:$0xff]  ;;  %v363_v24 = vld [vmem:[#allocation2 + $0x50] sm:$0xff]  ;;  %p1197_p2 = pnand %p1196_p13, %p1190_p1 }
  0x6c   : > { %1000 = vmatpush3.bf16.msra.mxu0 %v997_v7 }
  0x6d   : > { %1002 = vmatprep.subr.bf16.mxu0 %v1001_v10 }
  0x70   : > { %1004 = vmatpush3.bf16.msra.mxu0 %v1001_v10 }
  0x71   : > { %1006 = vmatprep.subr.bf16.mxu0 %v1005_v13 }
  0x74   : > { %1008 = vmatpush3.bf16.msra.mxu0 %v1005_v13 }
  0x75   : > { %1010 = vmatprep.subr.bf16.mxu0 %v1009_v16 }
  0x78   : > { %1012 = vmatpush3.bf16.msra.mxu0 %v1009_v16 }
  0x79   : > { %1014 = vmatprep.subr.bf16.mxu0 %v1013_v19 }
  0x7c   : > { %1016 = vmatpush3.bf16.msra.mxu0 %v1013_v19 }
  0x7d   : > { %1018 = vmatprep.subr.bf16.mxu0 %v1017_v22 }
  0x80   : > { %1020 = vmatpush3.bf16.msra.mxu0 %v1017_v22 }
  0x81   : > { %1022 = vmatprep.subr.bf16.mxu0 %v1021_v25 }
  0x84   : > { %1024 = vmatpush3.bf16.msra.mxu0 %v1021_v25 }
  0x87   : > { %935 = vmatmul.mubr.f32.vlgmr.msra.gmra.mrb[0].mxu0 %v370_v26 }
  0x88   : > { %937 = vmatprep.mubr.f32.mxu0 %v371_v27 }
  0x8b   : > { %938 = vmatmul.mubr.f32.gmra.mrb[2].mxu0 %v372_v28 }
  0x8c   : > { %940 = vmatprep.mubr.f32.mxu0 %v373_v29 }
  0x8f   : > { %941 = vmatmul.mubr.f32.gmra.mrb[4].mxu0 %v374_v30 }
  0x90   : > { %943 = vmatprep.mubr.f32.mxu0 %v375_v31 }
  0x93   : > { %944 = vmatmul.mubr.f32.gmra.mrb[6].mxu0 %v376_v32 }
  0x94   : > { %946 = vmatprep.mubr.f32.mxu0 %v377_v33 }
  0x97   : > { %947 = vmatmul.mubr.f32.gmra.mrb[8].mxu0 %v378_v34  ;;  %v366_v34 = vld [vmem:[#allocation2 + $0x68] sm:$0xff] }
  0x98   : > { %949 = vmatprep.mubr.f32.mxu0 %v379_v35 }
  0x9b   : > { %950 = vmatmul.mubr.f32.gmra.mrb[10].mxu0 %v380_v36 }
  0x9c   : > { %952 = vmatprep.mubr.f32.mxu0 %v381_v37  ;;  %v365_v37 = vld [vmem:[#allocation2 + $0x60] sm:$0xff] }
  0x9f   : > { %953 = vmatmul.mubr.f32.gmra.mrb[12].mxu0 %v382_v38 }
  0xa0   : > { %955 = vmatprep.mubr.f32.mxu0 %v383_v39 }
  0xa3   : > { %956 = vmatmul.mubr.f32.gmra.mrb[14].mxu0 %v384_v40 }
 0x15a   : > { %v936_v44 = vpop.f32.mrb[0].mxu0 }
 0x15b   : > { %v547_v45 = vadd.f32 %v936_v44, %v354_v42  ;;  %v467_v46 = vpop.f32.mrb[1].mxu0 }
 0x15c   : > { %v546_v47 = vadd.f32 %v467_v46, %v353_v43 }
 0x15d   : > { %564 = vst.msk [vmem:[#allocation2 + $0x8] sm:$0xff] %vm336_vm0, %v547_v45 }
 0x15e   : > { %563 = vst.msk [vmem:[#allocation2] sm:$0xff] %vm336_vm0, %v546_v47  ;;  %v939_v50 = vpop.f32.mrb[2].mxu0 }
 0x15f   : > { %v549_v51 = vadd.f32 %v939_v50, %v356_v48  ;;  %v477_v52 = vpop.f32.mrb[3].mxu0  ;;  %v368_v48 = vld [vmem:[#allocation2 + $0x78] sm:$0xff] }
 0x160   : > { %v548_v53 = vadd.f32 %v477_v52, %v355_v49 }
 0x161   : > { %566 = vst.msk [vmem:[#allocation2 + $0x18] sm:$0xff] %vm336_vm0, %v549_v51  ;;  %v367_v51 = vld [vmem:[#allocation2 + $0x70] sm:$0xff] }
 0x162   : > { %565 = vst.msk [vmem:[#allocation2 + $0x10] sm:$0xff] %vm336_vm0, %v548_v53  ;;  %v942_v56 = vpop.f32.mrb[4].mxu0 }
 0x163   : > { %v551_v58 = vadd.f32 %v942_v56, %v358_v54  ;;  %v487_v59 = vpop.f32.mrb[5].mxu0 }
 0x164   : > { %v550_v60 = vadd.f32 %v487_v59, %v357_v55  ;;  %v583_v62 = vld [vmem:[#allocation2 + $0x8] sm:$0xff] }
 0x165   : > { %568 = vst.msk [vmem:[#allocation2 + $0x28] sm:$0xff] %vm336_vm0, %v551_v58  ;;  %v582_v0 = vld [vmem:[#allocation2] sm:$0xff]  ;;  %v606_v1 = vadd.f32 %v1569_v57, %v583_v62 }
 0x166   : > { %567 = vst.msk [vmem:[#allocation2 + $0x20] sm:$0xff] %vm336_vm0, %v550_v60  ;;  %v945_v2 = vpop.f32.mrb[6].mxu0  ;;  %v605_v3 = vadd.f32 %v1569_v57, %v582_v0 }
 0x167   : > { %v553_v4 = vadd.f32 %v945_v2, %v360_v61  ;;  %v497_v5 = vpop.f32.mrb[7].mxu0  ;;  %v622_v6 = vmax.f32 %v606_v1, 0.0 }
 0x168   : > { %v552_v7 = vadd.f32 %v497_v5, %v359_v63  ;;  %v621_v9 = vmax.f32 %v605_v3, 0.0  ;;  %v585_v10 = vld [vmem:[#allocation2 + $0x18] sm:$0xff] }
 0x169   : > { %570 = vst.msk [vmem:[#allocation2 + $0x38] sm:$0xff] %vm336_vm0, %v553_v4  ;;  %v584_v12 = vld [vmem:[#allocation2 + $0x10] sm:$0xff]  ;;  %v608_v13 = vadd.f32 %v1569_v57, %v585_v10 }
 0x16a   : > { %569 = vst.msk [vmem:[#allocation2 + $0x30] sm:$0xff] %vm336_vm0, %v552_v7  ;;  %v948_v14 = vpop.f32.mrb[8].mxu0  ;;  %v1026_v15 = vpack.c.bf16 %v622_v6, %v621_v9  ;;  %v607_v16 = vadd.f32 %v1569_v57, %v584_v12 }
 0x16b   : > { %v555_v17 = vadd.f32 %v948_v14, %v362_v8  ;;  %v507_v18 = vpop.f32.mrb[9].mxu0  ;;  %v624_v19 = vmax.f32 %v608_v13, 0.0 }
 0x16c   : > { %v554_v20 = vadd.f32 %v507_v18, %v361_v11  ;;  %1027 = vmatpush3.bf16.msra.mxu1 %v1026_v15  ;;  %v623_v22 = vmax.f32 %v607_v16, 0.0  ;;  %v587_v23 = vld [vmem:[#allocation2 + $0x28] sm:$0xff] }
 0x16d   : > { %572 = vst.msk [vmem:[#allocation2 + $0x48] sm:$0xff] %vm336_vm0, %v555_v17  ;;  %1028 = vmatprep.subr.bf16.mxu1 %v1302_v41  ;;  %v586_v25 = vld [vmem:[#allocation2 + $0x20] sm:$0xff]  ;;  %v610_v26 = vadd.f32 %v1569_v57, %v587_v23 }
 0x16e   : > { %571 = vst.msk [vmem:[#allocation2 + $0x40] sm:$0xff] %vm336_vm0, %v554_v20  ;;  %v951_v27 = vpop.f32.mrb[10].mxu0  ;;  %v1029_v28 = vpack.c.bf16 %v624_v19, %v623_v22  ;;  %v609_v29 = vadd.f32 %v1569_v57, %v586_v25  ;;  %v637_v22 = vld [vmem:[%s1557_s17] sm:$0x3] }
 0x16f   : > { %v557_v30 = vadd.f32 %v951_v27, %v364_v21  ;;  %v517_v31 = vpop.f32.mrb[11].mxu0  ;;  %v626_v32 = vmax.f32 %v610_v26, 0.0  ;;  %v638_v21 = vld [vmem:[%s323_s11] sm:$0x3] }
 0x170   : > { %v556_v33 = vadd.f32 %v517_v31, %v363_v24  ;;  %1030 = vmatpush3.bf16.msra.mxu1 %v1029_v28  ;;  %v625_v35 = vmax.f32 %v609_v29, 0.0  ;;  %v589_v36 = vld [vmem:[#allocation2 + $0x38] sm:$0xff] }
 0x171   : > { %574 = vst.msk [vmem:[#allocation2 + $0x58] sm:$0xff] %vm336_vm0, %v557_v30  ;;  %1031 = vmatprep.subr.bf16.mxu1 %v1302_v41  ;;  %v588_v38 = vld [vmem:[#allocation2 + $0x30] sm:$0xff]  ;;  %v612_v39 = vadd.f32 %v1569_v57, %v589_v36 }
 0x172   : > { %573 = vst.msk [vmem:[#allocation2 + $0x50] sm:$0xff] %vm336_vm0, %v556_v33  ;;  %v954_v40 = vpop.f32.mrb[12].mxu0  ;;  %v1032_v42 = vpack.c.bf16 %v626_v32, %v625_v35  ;;  %v611_v43 = vadd.f32 %v1569_v57, %v588_v38 }
 0x173   : > { %v559_v44 = vadd.f32 %v954_v40, %v366_v34  ;;  %v527_v45 = vpop.f32.mrb[13].mxu0  ;;  %v628_v46 = vmax.f32 %v612_v39, 0.0 }
 0x174   : > { %v558_v47 = vadd.f32 %v527_v45, %v365_v37  ;;  %1033 = vmatpush3.bf16.msra.mxu1 %v1032_v42  ;;  %v627_v49 = vmax.f32 %v611_v43, 0.0  ;;  %v591_v50 = vld [vmem:[#allocation2 + $0x48] sm:$0xff] }
 0x175   : > { %576 = vst.msk [vmem:[#allocation2 + $0x68] sm:$0xff] %vm336_vm0, %v559_v44  ;;  %1034 = vmatprep.subr.bf16.mxu1 %v1302_v41  ;;  %v590_v52 = vld [vmem:[#allocation2 + $0x40] sm:$0xff]  ;;  %v614_v53 = vadd.f32 %v1569_v57, %v591_v50 }
 0x176   : > { %575 = vst.msk [vmem:[#allocation2 + $0x60] sm:$0xff] %vm336_vm0, %v558_v47  ;;  %v957_v54 = vpop.f32.mrb[14].mxu0  ;;  %v1035_v55 = vpack.c.bf16 %v628_v46, %v627_v49  ;;  %v613_v56 = vadd.f32 %v1569_v57, %v590_v52 }
 0x177   : > { %v561_v58 = vadd.f32 %v957_v54, %v368_v48  ;;  %v537_v59 = vpop.f32.mrb[15].mxu0  ;;  %v630_v60 = vmax.f32 %v614_v53, 0.0 }
 0x178   : > { %v560_v61 = vadd.f32 %v537_v59, %v367_v51  ;;  %1036 = vmatpush3.bf16.msra.mxu1 %v1035_v55  ;;  %v629_v62 = vmax.f32 %v613_v56, 0.0  ;;  %v593_v63 = vld [vmem:[#allocation2 + $0x58] sm:$0xff] }
 0x179   : > { %578 = vst.msk [vmem:[#allocation2 + $0x78] sm:$0xff] %vm336_vm0, %v561_v58  ;;  %1037 = vmatprep.subr.bf16.mxu1 %v1302_v41  ;;  %v592_v0 = vld [vmem:[#allocation2 + $0x50] sm:$0xff]  ;;  %v616_v1 = vadd.f32 %v1569_v57, %v593_v63 }
 0x17a   : > { %577 = vst.msk [vmem:[#allocation2 + $0x70] sm:$0xff] %vm336_vm0, %v560_v61  ;;  %v1038_v2 = vpack.c.bf16 %v630_v60, %v629_v62  ;;  %v615_v3 = vadd.f32 %v1569_v57, %v592_v0 }
 0x17b   : > { %v632_v4 = vmax.f32 %v616_v1, 0.0 }
 0x17c   : > { %1039 = vmatpush3.bf16.msra.mxu1 %v1038_v2  ;;  %v631_v5 = vmax.f32 %v615_v3, 0.0  ;;  %v595_v6 = vld [vmem:[#allocation2 + $0x68] sm:$0xff] }
 0x17d   : > { %1040 = vmatprep.subr.bf16.mxu1 %v1302_v41  ;;  %v594_v7 = vld [vmem:[#allocation2 + $0x60] sm:$0xff]  ;;  %v618_v8 = vadd.f32 %v1569_v57, %v595_v6 }
 0x17e   : > { %v1041_v9 = vpack.c.bf16 %v632_v4, %v631_v5  ;;  %v617_v10 = vadd.f32 %v1569_v57, %v594_v7 }
 0x17f   : > { %v634_v11 = vmax.f32 %v618_v8, 0.0 }
 0x180   : > { %1042 = vmatpush3.bf16.msra.mxu1 %v1041_v9  ;;  %v633_v12 = vmax.f32 %v617_v10, 0.0  ;;  %v597_v13 = vld [vmem:[#allocation2 + $0x78] sm:$0xff] }
 0x181   : > { %1043 = vmatprep.subr.bf16.mxu1 %v1302_v41  ;;  %v596_v14 = vld [vmem:[#allocation2 + $0x70] sm:$0xff]  ;;  %v620_v15 = vadd.f32 %v1569_v57, %v597_v13 }
 0x182   : > { %v1044_v16 = vpack.c.bf16 %v634_v11, %v633_v12  ;;  %v619_v17 = vadd.f32 %v1569_v57, %v596_v14 }
 0x183   : > { %v636_v18 = vmax.f32 %v620_v15, 0.0 }
 0x184   : > { %1045 = vmatpush3.bf16.msra.mxu1 %v1044_v16  ;;  %v635_v19 = vmax.f32 %v619_v17, 0.0 }
 0x185   : > { %1046 = vmatprep.subr.bf16.mxu1 %v1302_v41 }
 0x186   : > { %v1047_v20 = vpack.c.bf16 %v636_v18, %v635_v19 }
 0x188   : > { %1048 = vmatpush3.bf16.msra.mxu1 %v1047_v20 }
 0x18b   : > { %991 = vmatmul.mubr.f32.vlgmr.msra.gmra.mrb[0].mxu1 %v638_v21 }
 0x25e   : > { %v705_v57 = vpop.f32.mrb[0].mxu1 }
 0x25f   : > { %v709_v23 = vadd.f32 %v705_v57, %v637_v22  ;;  %v992_v24 = vpop.f32.mrb[1].mxu1 }
 0x261   : > { %711 = vst.msk [vmem:[%s1557_s17] sm:$0x3] %vm331_vm2, %v709_v23 }
 0x262   : > { %1200 = shalt.err (!%p1197_p2)
}
 0x263   : > { %s1201_s22 = scalar_lea.hbm %s1617_s12, 32  ;;  %s1205_s9 = scalar_lea.hbm %s1683_s5, 64 }
 0x264   : > { %p1202_p8 = scmp.ne.s32.totalorder %s1617_s12, %s1201_s22  ;;  %p1206_p12 = scmp.lt.u32.totalorder %s1617_s12, %s1683_s5 }
 0x265   : > { %p1207_p0 = scmp.lt.u32.totalorder %s1205_s9, %s1201_s22  ;;  %p1209_p5 = scmp.lt.u32.totalorder %s1201_s22, %s1617_s12 }
 0x266   : > { %p1203_p9 = pnand %p1202_p8, %p1697_p10 }
 0x267   : > { %p1208_p3 = por %p1207_p0, %p1206_p12 }
 0x268   : > { %p1204_p11 = pneg %p1203_p9 }
 0x269   : > { %p1210_p7 = por %p1209_p5, %p1208_p3 }
 0x26b   : > { %p1211_p1 = pnand %p1210_p7, %p1204_p11 }
 0x26d   : > { %1214 = shalt.err (!%p1211_p1)
}
 0x26e   : > { %1053 = dma.vmem_to_hbm [thread:$0]  (%p1697_p10), %s1619_s27, 32, %s1617_s12, %s713_s10  }
 0x26f PF: > { %s738_s11 = sand.u32 1, %s1263_s23   ;;  %p1698_p4 = scmp.ne.s32.totalorder %s1692_s19, 0 }
 0x270   : > { %p1699_p6 = scmp.ge.s32.totalorder %s1295_s30, 2  ;;  %s739_s20 = scalar_lea.sflag [#allocation7], %s738_s11 }
 0x272   : > { %p1062_p13 = pnand %p1699_p6, %p1698_p4 }
 0x274   : > { %1258 = dma.done.wait (!%p1062_p13), %s739_s20, 32  }
 0x275   : > { %1260 = vsyncadd (!%p1062_p13), %s739_s20, 4294967264  ;;  %s27_s30 = sadd.s32 1, %s1295_s30   ;;  %s1700_s16 = sld [smem:[#allocation14_spill]] }
 0x276   : > { %p24_p2 = scmp.ge.s32.totalorder %s27_s30, 4   ;;  %s1701_s27 = sld [smem:[#allocation16_spill]] }
 0x277   : > { %s1702_s14 = sld [smem:[#allocation15_spill]]  ;;  %s1703_s23 = smov %s1267_s0 }
 0x278   : > { %s1704_s0 = smov %s1271_s24  ;;  %s1705_s24 = smov %s1403_s15 }
 0x279   : > { %s1706_s25 = smov %s1279_s26  ;;  %s1708_s28 = smov %s1291_s29 }
 0x27a   :  { %26 = sbr.rel (!%p24_p2) target bundleno = 23 (0x17), region = 99 }
 0x27b   : > { %s1707_s26 = smov %s1700_s16 }
 0x27d   : > { %s1709_s29 = smov %s1702_s14 }
 0x281   :  { %744 = vsyncpa [#allocation6], 1 }
 0x282   :  { %746 = vsyncpa [#allocation6 + $0x1], 1 }
 0x283   :  { %747 = vsyncpa [#allocation7], 1 }
 0x284   :  { %749 = vsyncpa [#allocation7 + $0x1], 1 }

</bundles_post_ra>
